<compile_context>
chip_gen: v6e
topology: v6e:2x2x1
jax: 0.10.0
libtpu: 0.0.40
codegen_flags: <defaults>
</compile_context>

<pallas_src>
import functools

import jax
import jax.numpy as jnp
from jax.experimental import pallas as pl
from jax.experimental.pallas import tpu as pltpu

_BN_EPS = 1e-5
_LANE = 128
_SUB = 8


def _round_up(v, m):
    return ((v + m - 1) // m) * m


def _conv_stats_kernel(x_ref, w_ref, mask_ref, sum_ref, sq_ref):
    """Pass 1: conv for one sample (single fused MXU dot) + per-channel sum/sumsq."""
    @pl.when(pl.program_id(0) == 0)
    def _():
        sum_ref[...] = jnp.zeros_like(sum_ref)
        sq_ref[...] = jnp.zeros_like(sq_ref)

    # (Co_pad, 3*Ci_pad) bf16 x (3*Ci_pad, 2*Lo_pad) bf16 -> f32 accumulate.
    y = jnp.dot(w_ref[...], x_ref[...], preferred_element_type=jnp.float32)
    ym = y * mask_ref[...]                       # zero the padded conv positions
    sum_ref[...] += ym.sum(axis=1, keepdims=True)
    sq_ref[...] += (ym * ym).sum(axis=1, keepdims=True)


def _bn_relu_pool_kernel(inv_count, lo_pad,
                         x_ref, w_ref, mask_ref, edge_ref,
                         sum_ref, sq_ref, gamma_ref, beta_ref, o_ref):
    """Pass 2: recompute conv, BN (training-mode batch stats), ReLU, MaxPool(3,2,1)."""
    y = jnp.dot(w_ref[...], x_ref[...], preferred_element_type=jnp.float32)
    mean = sum_ref[...] * inv_count                       # (Co_pad, 1)
    var = sq_ref[...] * inv_count - mean * mean           # biased var (PyTorch train BN)
    inv = jax.lax.rsqrt(var + _BN_EPS)
    scale = gamma_ref[...] * inv
    shift = beta_ref[...] - mean * scale
    # BN + ReLU; invalid (padding) columns forced to 0 — exact for the max-pool
    # because ReLU output is >= 0.
    r = jnp.maximum(y * scale + shift, 0.0) * mask_ref[...]   # (Co_pad, 2*Lo_pad)
    r_even = r[:, :lo_pad]       # r_even[:, j] = relu_bn(conv)[2*j]
    r_odd = r[:, lo_pad:]        # r_odd [:, j] = relu_bn(conv)[2*j + 1]
    # tap 2*j - 1 == r_odd[:, j-1]; lane 0 gets the pool's zero padding via the
    # precomputed edge mask (XLU roll + VPU multiply, no matmul, no iota rebuild).
    prev_odd = pltpu.roll(r_odd, shift=1, axis=1) * edge_ref[...]
    o_ref[...] = jnp.maximum(jnp.maximum(r_even, r_odd), prev_odd)


def conv_layer_forward(x, w, gamma, beta):
    """x: (N, C_in, L); w: (C_out, C_in, 3); gamma/beta: (C_out,) -> (N, C_out, L_out)."""
    N, C_in, L = x.shape
    C_out = w.shape[0]
    L_out = (L - 1) // 2 + 1            # pooled length == # even conv positions
    n_odd = L - L_out                   # # odd conv positions
    Ci_pad = _round_up(C_in, _SUB)
    Co_pad = _round_up(C_out, _SUB)
    Lo_pad = _round_up(L_out, _LANE)    # lane-dense pooled length

    # ---------- wrapper-side layout glue (pure JAX) ----------
    x32 = x.astype(jnp.float32)
    # channel pad + conv zero-pad (1 left) + pad temporal axis out to 2*Lo_pad + 2
    xpp = jnp.pad(x32, ((0, 0), (0, Ci_pad - C_in), (1, 2 * Lo_pad - L + 1)))
    # even/odd im2col: row block k holds x[c, 2j + k - 1] (even) / x[c, 2j + k] (odd)
    x_even = jnp.concatenate([xpp[:, :, k:k + 2 * Lo_pad:2] for k in range(3)], axis=1)
    x_odd = jnp.concatenate([xpp[:, :, k + 1:k + 1 + 2 * Lo_pad:2] for k in range(3)], axis=1)
    x_eo = jnp.concatenate([x_even, x_odd], axis=2).astype(jnp.bfloat16)  # (N, 3*Ci_pad, 2*Lo_pad)

    w_pad = jnp.zeros((Co_pad, Ci_pad, 3), jnp.float32).at[:C_out, :C_in, :].set(
        w.astype(jnp.float32))
    w2 = jnp.transpose(w_pad, (0, 2, 1)).reshape(Co_pad, 3 * Ci_pad).astype(jnp.bfloat16)

    g = jnp.zeros((Co_pad, 1), jnp.float32).at[:C_out, 0].set(gamma.astype(jnp.float32))
    b = jnp.zeros((Co_pad, 1), jnp.float32).at[:C_out, 0].set(beta.astype(jnp.float32))

    col = jnp.arange(2 * Lo_pad)
    mask = ((col < L_out) | ((col >= Lo_pad) & (col < Lo_pad + n_odd))
            ).astype(jnp.float32).reshape(1, 2 * Lo_pad)          # valid conv positions
    edge = (jnp.arange(Lo_pad) > 0).astype(jnp.float32).reshape(1, Lo_pad)

    x_spec = pl.BlockSpec((None, 3 * Ci_pad, 2 * Lo_pad), lambda n: (n, 0, 0))
    w_spec = pl.BlockSpec((Co_pad, 3 * Ci_pad), lambda n: (0, 0))
    mask_spec = pl.BlockSpec((1, 2 * Lo_pad), lambda n: (0, 0))
    edge_spec = pl.BlockSpec((1, Lo_pad), lambda n: (0, 0))
    ch_spec = pl.BlockSpec((Co_pad, 1), lambda n: (0, 0))

    # ---- pass 1: conv + per-channel sum / sum-of-squares accumulators over (N, L) ----
    stat_shape = jax.ShapeDtypeStruct((Co_pad, 1), jnp.float32)
    y_sum, y_sq = pl.pallas_call(
        _conv_stats_kernel,
        grid=(N,),
        in_specs=[x_spec, w_spec, mask_spec],
        out_specs=[ch_spec, ch_spec],
        out_shape=[stat_shape, stat_shape],
        compiler_params=pltpu.CompilerParams(
            dimension_semantics=("arbitrary",),     # stats accumulate across samples
            vmem_limit_bytes=48 * 1024 * 1024),
    )(x_eo, w2, mask)

    # ---- pass 2: normalize + ReLU + maxpool, lane-dense output, parallel over N ----
    kernel2 = functools.partial(_bn_relu_pool_kernel, 1.0 / float(N * L), Lo_pad)
    out_full = pl.pallas_call(
        kernel2,
        grid=(N,),
        in_specs=[x_spec, w_spec, mask_spec, edge_spec, ch_spec, ch_spec, ch_spec, ch_spec],
        out_specs=pl.BlockSpec((None, Co_pad, Lo_pad), lambda n: (n, 0, 0)),
        out_shape=jax.ShapeDtypeStruct((N, Co_pad, Lo_pad), jnp.float32),
        compiler_params=pltpu.CompilerParams(
            dimension_semantics=("parallel",),      # independent samples -> dual TC (v7x)
            vmem_limit_bytes=48 * 1024 * 1024),
    )(x_eo, w2, mask, edge, y_sum, y_sq, g, b)

    return out_full[:, :C_out, :L_out]


def _reference(x, w, gamma, beta):
    """Pure-JAX reference (PyTorch training-mode BN); uses the same bf16-rounded
    MXU operands as the kernel so only accumulation-order noise remains."""
    xr = x.astype(jnp.bfloat16).astype(jnp.float32)
    wr = w.astype(jnp.bfloat16).astype(jnp.float32)
    N, C_in, L = x.shape
    C_out = w.shape[0]
    xp = jnp.pad(xr, ((0, 0), (0, 0), (1, 1)))
    y = jnp.zeros((N, C_out, L), jnp.float32)
    for dk in range(3):
        y = y + jnp.einsum('oc,ncl->nol', wr[:, :, dk], xp[:, :, dk:dk + L])
    mean = y.mean(axis=(0, 2), keepdims=True)
    var = ((y - mean) ** 2).mean(axis=(0, 2), keepdims=True)
    yn = (y - mean) / jnp.sqrt(var + _BN_EPS) * gamma.reshape(1, -1, 1) \
        + beta.reshape(1, -1, 1)
    r = jnp.maximum(yn, 0.0)
    rp = jnp.pad(r, ((0, 0), (0, 0), (1, 1)), constant_values=-jnp.inf)
    L_out = (L - 1) // 2 + 1
    return jnp.stack([jnp.max(rp[:, :, 2 * j:2 * j + 3], axis=-1)
                      for j in range(L_out)], axis=-1)


if __name__ == "__main__":
    key = jax.random.PRNGKey(0)
    k1, k2, k3, k4 = jax.random.split(key, 4)
    N, C_in, C_out, L = 2, 4, 8, 16
    x = jax.random.normal(k1, (N, C_in, L), jnp.float32)
    # Deterministic synthetic parameters (Conv1d weight, BN affine params).
    w = 0.2 * jax.random.normal(k2, (C_out, C_in, 3), jnp.float32)
    gamma = 1.0 + 0.1 * jax.random.normal(k3, (C_out,), jnp.float32)
    beta = 0.1 * jax.random.normal(k4, (C_out,), jnp.float32)

    out = conv_layer_forward(x, w, gamma, beta)
    out = jax.block_until_ready(out)

    ref = _reference(x, w, gamma, beta)
    assert out.shape == (N, C_out, (L - 1) // 2 + 1), out.shape
    err = float(jnp.max(jnp.abs(out - ref)))
    assert jnp.allclose(out, ref, atol=1e-3, rtol=1e-3), f"max abs err {err}"
    print("KERNEL_OK")
</pallas_src>

<mosaic_0001>
module attributes {stable_mosaic.version = 11 : i64} {
  func.func @_conv_stats_kernel(%arg0: i32, %arg1: memref<1x24x256xbf16, #tpu.memory_space<vmem>>, %arg2: memref<8x24xbf16, #tpu.memory_space<vmem>>, %arg3: memref<1x256xf32, #tpu.memory_space<vmem>>, %arg4: memref<8x1xf32, #tpu.memory_space<vmem>>, %arg5: memref<8x1xf32, #tpu.memory_space<vmem>>) attributes {dimension_semantics = [#tpu.dimension_semantics<arbitrary>], iteration_bounds = array<i64: 2>, scalar_prefetch = 0 : i64, scratch_operands = 0 : i64, tpu.core_type = #tpu.core_type<tc>, window_params = [{transform_indices = @transform_0, window_bounds = array<i64: 1, 24, 256>}, {pipeline_mode = #tpu.pipeline_mode<synchronous>, transform_indices = @transform_1, window_bounds = array<i64: 8, 24>}, {pipeline_mode = #tpu.pipeline_mode<synchronous>, transform_indices = @transform_2, window_bounds = array<i64: 1, 256>}, {pipeline_mode = #tpu.pipeline_mode<synchronous>, transform_indices = @transform_3, window_bounds = array<i64: 8, 1>}, {pipeline_mode = #tpu.pipeline_mode<synchronous>, transform_indices = @transform_4, window_bounds = array<i64: 8, 1>}]} {
    %c0_i32 = arith.constant 0 : i32
    %0 = arith.cmpi eq, %arg0, %c0_i32 : i32
    %1 = arith.extui %0 : i1 to i32
    %c0_i32_0 = arith.constant 0 : i32
    %2 = arith.cmpi ne, %1, %c0_i32_0 : i32
    scf.if %2 {
      %cst_17 = arith.constant 0.000000e+00 : f32
      %21 = vector.broadcast %cst_17 : f32 to vector<8x1xf32>
      %c0_18 = arith.constant 0 : index
      %c0_19 = arith.constant 0 : index
      %22 = vector.load %arg4[%c0_18, %c0_19] : memref<8x1xf32, #tpu.memory_space<vmem>>, vector<8x1xf32>
      tpu.vector_store %arg4[%c0_18, %c0_19], %21 {strides = array<i32>} : memref<8x1xf32, #tpu.memory_space<vmem>>, vector<8x1xf32>,
      %cst_20 = arith.constant 0.000000e+00 : f32
      %23 = vector.broadcast %cst_20 : f32 to vector<8x1xf32>
      %c0_21 = arith.constant 0 : index
      %c0_22 = arith.constant 0 : index
      %24 = vector.load %arg5[%c0_21, %c0_22] : memref<8x1xf32, #tpu.memory_space<vmem>>, vector<8x1xf32>
      tpu.vector_store %arg5[%c0_21, %c0_22], %23 {strides = array<i32>} : memref<8x1xf32, #tpu.memory_space<vmem>>, vector<8x1xf32>,
    } else {
    }
    %c0 = arith.constant 0 : index
    %c0_1 = arith.constant 0 : index
    %3 = vector.load %arg2[%c0, %c0_1] : memref<8x24xbf16, #tpu.memory_space<vmem>>, vector<8x24xbf16>
    %c0_2 = arith.constant 0 : index
    %c0_3 = arith.constant 0 : index
    %c0_4 = arith.constant 0 : index
    %4 = vector.load %arg1[%c0_2, %c0_3, %c0_4] : memref<1x24x256xbf16, #tpu.memory_space<vmem>>, vector<1x24x256xbf16>
    %5 = vector.shape_cast %4 : vector<1x24x256xbf16> to vector<24x256xbf16>
    %cst = arith.constant dense<0.000000e+00> : vector<8x256xf32>
    %6 = tpu.matmul %3, %5, %cst {dimension_numbers = #tpu.dot_dimension_numbers<[1], [0], [0], [1], [0, 0, 1, 1], [], []>} : vector<8x24xbf16>, vector<24x256xbf16>, vector<8x256xf32> -> vector<8x256xf32>
    %c0_5 = arith.constant 0 : index
    %c0_6 = arith.constant 0 : index
    %7 = vector.load %arg3[%c0_5, %c0_6] : memref<1x256xf32, #tpu.memory_space<vmem>>, vector<1x256xf32>
    %8 = vector.broadcast %7 : vector<1x256xf32> to vector<8x256xf32>
    %9 = arith.mulf %6, %8 : vector<8x256xf32>
    %c0_7 = arith.constant 0 : index
    %c0_8 = arith.constant 0 : index
    %10 = vector.load %arg4[%c0_7, %c0_8] : memref<8x1xf32, #tpu.memory_space<vmem>>, vector<8x1xf32>
    %cst_9 = arith.constant dense<0.000000e+00> : vector<8xf32>
    %11 = vector.multi_reduction <add>, %9, %cst_9 [1] : vector<8x256xf32> to vector<8xf32>
    %12 = vector.shape_cast %11 : vector<8xf32> to vector<8x1xf32>
    %13 = arith.addf %10, %12 : vector<8x1xf32>
    %c0_10 = arith.constant 0 : index
    %c0_11 = arith.constant 0 : index
    %14 = vector.load %arg4[%c0_10, %c0_11] : memref<8x1xf32, #tpu.memory_space<vmem>>, vector<8x1xf32>
    tpu.vector_store %arg4[%c0_10, %c0_11], %13 {strides = array<i32>} : memref<8x1xf32, #tpu.memory_space<vmem>>, vector<8x1xf32>,
    %c0_12 = arith.constant 0 : index
    %c0_13 = arith.constant 0 : index
    %15 = vector.load %arg5[%c0_12, %c0_13] : memref<8x1xf32, #tpu.memory_space<vmem>>, vector<8x1xf32>
    %16 = arith.mulf %9, %9 : vector<8x256xf32>
    %cst_14 = arith.constant dense<0.000000e+00> : vector<8xf32>
    %17 = vector.multi_reduction <add>, %16, %cst_14 [1] : vector<8x256xf32> to vector<8xf32>
    %18 = vector.shape_cast %17 : vector<8xf32> to vector<8x1xf32>
    %19 = arith.addf %15, %18 : vector<8x1xf32>
    %c0_15 = arith.constant 0 : index
    %c0_16 = arith.constant 0 : index
    %20 = vector.load %arg5[%c0_15, %c0_16] : memref<8x1xf32, #tpu.memory_space<vmem>>, vector<8x1xf32>
    tpu.vector_store %arg5[%c0_15, %c0_16], %19 {strides = array<i32>} : memref<8x1xf32, #tpu.memory_space<vmem>>, vector<8x1xf32>,
    return
  }
  func.func @transform_0(%arg0: i32) -> (i32, i32, i32) {
    %c0_i32 = arith.constant 0 : i32
    %c0_i32_0 = arith.constant 0 : i32
    %c0_i32_1 = arith.constant 0 : i32
    return %arg0, %c0_i32, %c0_i32_0 : i32, i32, i32
  }
  func.func @transform_1(%arg0: i32) -> (i32, i32) {
    %c0_i32 = arith.constant 0 : i32
    %c0_i32_0 = arith.constant 0 : i32
    %c0_i32_1 = arith.constant 0 : i32
    return %c0_i32, %c0_i32_0 : i32, i32
  }
  func.func @transform_2(%arg0: i32) -> (i32, i32) {
    %c0_i32 = arith.constant 0 : i32
    %c0_i32_0 = arith.constant 0 : i32
    %c0_i32_1 = arith.constant 0 : i32
    return %c0_i32, %c0_i32_0 : i32, i32
  }
  func.func @transform_3(%arg0: i32) -> (i32, i32) {
    %c0_i32 = arith.constant 0 : i32
    %c0_i32_0 = arith.constant 0 : i32
    %c0_i32_1 = arith.constant 0 : i32
    return %c0_i32, %c0_i32_0 : i32, i32
  }
  func.func @transform_4(%arg0: i32) -> (i32, i32) {
    %c0_i32 = arith.constant 0 : i32
    %c0_i32_0 = arith.constant 0 : i32
    %c0_i32_1 = arith.constant 0 : i32
    return %c0_i32, %c0_i32_0 : i32, i32
  }
}

</mosaic_0001>

<bundles_post_ra>
// kernel: tpu_custom_call.1
= control target key start
LH: loop header
LB: loop body
LE: loop exit
PB: predicated region body
PF: predicated region fallthrough
CT: control target
= control target key end

     0   :  { %10 = vsyncpa [#allocation3], 0  ;;  %s735_s0 = inlined_call_operand.hbm [shape: bf16[2,24,256], index: 0, kind: input, shape index: {}]   ;;  %s736_s1 = inlined_call_operand.hbm [shape: bf16[8,24], index: 1, kind: input, shape index: {}]   ;;  %s737_s2 = inlined_call_operand.vmem [shape: f32[1,256], index: 2, kind: input, shape index: {}]   ;;  %s738_s3 = inlined_call_operand.vmem [shape: f32[8,1], index: 3, kind: output, shape index: {0}]   ;;  %s739_s4 = inlined_call_operand.vmem [shape: f32[8,1], index: 4, kind: output, shape index: {1}]  }
   0x1   :  { %12 = vsyncpa [#allocation3 + $0x1], 0 }
   0x2   :  { %13 = vsyncpa [#allocation5], 0  ;;  %s580_s15 = smov 0   ;;  %s582_s16 = smov 0  }
   0x3   :  { %s584_s17 = smov 0   ;;  %s586_s18 = smov 0  }
   0x4 LB: > { %s377_s19 = sadd.s32 4294967295, %s547_s18   ;;  %s600_s20 = sadd.s32 1, %s547_s18   ;;  %s547_s18 = sphi %s586_s18, %s758_s18   ;;  %s543_s17 = sphi %s584_s17, %s757_s17   ;;  %s539_s16 = sphi %s582_s16, %s756_s16   ;;  %s535_s15 = sphi %s580_s15, %s755_s15  }
   0x5   : > { %s23_s21 = ssub.s32 %s547_s18, %s600_s20  ;;  %s26_s22 = sadd.s32 1, %s543_s17 }
   0x6   : > { %p24_p0 = scmp.eq.s32.totalorder %s23_s21, 0  ;;  %p33_p1 = scmp.ne.s32.totalorder %s543_s17, %s539_s16 }
   0x7   : > { %p34_p2 = scmp.eq.s32.totalorder %s547_s18, 0  ;;  %p39_p3 = scmp.ne.s32.totalorder %s539_s16, %s535_s15 }
   0x8   : > { %s610_s23 = scalar_select %p24_p0, %s543_s17, %s26_s22  }
   0x9   : > { %p612_p4 = por %p34_p2, %p33_p1  ;;  %p616_p5 = scmp.eq.s32.totalorder %s377_s19, 0 }
   0xa   : > { %p378_p6 = scmp.ge.s32.totalorder %s547_s18, 1  ;;  %p134_p7 = scmp.lt.s32.totalorder %s547_s18, 3 }
   0xb   : > { %s745_s25 = scalar_select %p616_p5, 1, 0 }
   0xc   : > { %p624_p8 = por %p616_p5, %p39_p3  ;;  %p628_p9 = scmp.ne.s32.totalorder %s377_s19, 0 }
   0xd   : > { %p632_p10 = pnand %p378_p6, %p134_p7  ;;  %s549_s29 = smov [#allocation4]  }
   0xe   : > { %s746_s26 = scalar_select %p624_p8, 1, 0 }
   0xf   : > { %s747_s27 = scalar_select %p628_p9, 1, 0 }
  0x10   : > { %s748_s28 = scalar_select %p632_p10, 1, 0 }
  0x11   : > { %s147_s30 = sshll.u32 %s549_s29, 4  ;;  %p402_p11 = pneg %p632_p10  ;;  %s148_s30 = int_to_ptr.vmem [resolvable:$true] %s147_s30 }
  0x12   : > { %p411_p12 = scmp.lt.s32.totalorder %s547_s18, 2  ;;  %s161_s5 = sand.u32 1, %s543_s17  }
  0x13   : > { %p642_p13 = pnand %p402_p11, %p616_p5  ;;  %s393_s8 = smul.u32 24, %s161_s5 }
  0x14   : > { %p648_p0 = pnand %p411_p12, %p612_p4  ;;  %s394_s9 = smul.u32 384, %s547_s18 }
  0x15   : > { %p457_p1 = pneg %p642_p13  ;;  %s466_s10 = scalar_lea.vmem %s148_s30, 64 }
  0x16   : > { %p467_p2 = scmp.ne.s32.totalorder %s148_s30, %s466_s10  ;;  %p474_p7 = scmp.lt.s32.totalorder %s148_s30, %s148_s30 }
  0x17   : > { %p475_p9 = scmp.lt.s32.totalorder %s466_s10, %s466_s10 }
  0x18   : > { %p469_p3 = pnand %p467_p2, %p457_p1 }
  0x19   : > { %p476_p11 = por %p475_p9, %p474_p7 }
  0x1a   : > { %p470_p6 = pneg %p469_p3 }
  0x1c   : > { %p477_p5 = pnand %p476_p11, %p470_p6 }
  0x1e   : > { %480 = shalt.err (!%p477_p5)
}
  0x1f   : > { %405 = dma.hbm_to_vmem [thread:$0]  (!%p642_p13), %s736_s1, 64, %s148_s30, [#allocation5]  }
  0x20   : > { %s663_s15 = scalar_lea.hbm %s735_s0, %s394_s9  ;;  %s165_s18 = scalar_lea.vmem [#allocation2], %s393_s8 }
  0x21   : > { %s172_s19 = sshll.u32 %s165_s18, 4  ;;  %s667_s21 = scalar_lea.sflag [#allocation3], %s161_s5  ;;  %s665_s19 = int_to_ptr.vmem [resolvable:$true] %s172_s19 }
  0x22   : > { %s481_s22 = scalar_lea.hbm %s663_s15, 384  ;;  %p483_p5 = pneg %p648_p0 }
  0x23   : > { %p482_p4 = scmp.ne.s32.totalorder %s663_s15, %s481_s22  ;;  %s486_s30 = scalar_lea.hbm %s735_s0, 768 }
  0x24   : > { %p487_p13 = scmp.lt.s32.totalorder %s663_s15, %s735_s0  ;;  %p488_p1 = scmp.lt.s32.totalorder %s486_s30, %s481_s22 }
  0x25   : > { %p484_p9 = pnand %p483_p5, %p482_p4 }
  0x26   : > { %p489_p2 = por %p488_p1, %p487_p13 }
  0x27   : > { %p485_p12 = pneg %p484_p9 }
  0x29   : > { %p490_p3 = pnand %p489_p2, %p485_p12 }
  0x2b   : > { %493 = shalt.err (!%p490_p3)
}
  0x2c   : > { %s494_s5 = scalar_lea.vmem %s665_s19, 384  ;;  %s550_s8 = smov [#allocation2]  }
  0x2d   : > { %p495_p6 = scmp.ne.s32.totalorder %s665_s19, %s494_s5  ;;  %s499_s10 = sshll.u32 %s550_s8, 4  ;;  %s500_s10 = int_to_ptr.vmem [resolvable:$false] %s499_s10 }
  0x2e   : > { %s501_s11 = scalar_lea.vmem %s500_s10, 768  ;;  %p502_p4 = scmp.lt.s32.totalorder %s665_s19, %s500_s10 }
  0x2f   : > { %p497_p7 = pnand %p495_p6, %p483_p5  ;;  %p503_p9 = scmp.lt.s32.totalorder %s501_s11, %s494_s5 }
  0x31   : > { %p498_p11 = pneg %p497_p7  ;;  %p504_p8 = por %p503_p9, %p502_p4 }
  0x33   : > { %p505_p10 = pnand %p504_p8, %p498_p11 }
  0x35   : > { %508 = shalt.err (!%p505_p10)
}
  0x36   : > { %s551_s12 = smov 128   ;;  %s552_s13 = smov 8  }
  0x37   : > { %409 = dma.hbm_to_vmem [thread:$0]  (!%p648_p0), %s663_s15, 384, %s665_s19, %s667_s21, %s551_s12, %s551_s12, %s552_s13  }
  0x38   : > { %p751_p5 = scmp.ne.s32.totalorder %s748_s28, 0 }
  0x39   : > { %s186_s14 = sand.u32 (!%p751_p5), 1, %s539_s16   ;;  %p752_p12 = scmp.ne.s32.totalorder (!%p751_p5), %s746_s26, 0 }
  0x3a   : > { %184 = sbr.rel (%p751_p5) target bundleno = 431 (0x1af), region = 32  ;;  %s187_s22 = scalar_lea.sflag (!%p751_p5), [#allocation3], %s186_s14 }
  0x3b   : > { %s395_s18 = smul.u32 (!%p751_p5), 24, %s186_s14 }
  0x3d   : > { %s190_s24 = scalar_lea.vmem (!%p751_p5), [#allocation2], %s395_s18 }
  0x3f   : > { %526 = dma.done.wait (%p752_p12), %s187_s22, 384  }
  0x40   : > { %528 = vsyncadd (%p752_p12), %s187_s22, 4294966912  ;;  %p753_p8 = scmp.ne.s32.totalorder %s745_s25, 0 }
  0x42   : > { %530 = dma.done.wait (%p753_p8), [#allocation5], 64  }
  0x43   : > { %532 = vsyncadd (%p753_p8), [#allocation5], 4294967232  ;;  %p754_p10 = scmp.ne.s32.totalorder %s747_s27, 0 }
  0x45   : > { %218 = sbr.rel (%p754_p10) target bundleno = 76 (0x4c), region = 44 }
  0x4a   : > { %vm219_vm0 = vcmask 7168   ;;  %v553_v0 = vmov 0.0  }
  0x4b   : > { %220 = vst.msk [vmem:[%s738_s3] sm:$0xff] %vm219_vm0, %v553_v0  ;;  %221 = vst.msk [vmem:[%s739_s4] sm:$0xff] %vm219_vm0, %v553_v0 }
  0x4c PF: > { %v225_v1 = vld [vmem:[%s190_s24 + $0x10] sm:$0xff]  ;;  %vm245_vm1 = vcmask 1043456   ;;  %v452_v4 = vld [vmem:[%s190_s24 + $0x4] ss:$8 sps:$4 sm:$0xff]   ;;  %v554_v5 = vmov 0   ;;  %vm241_vm2 = vcmask 195584   ;;  %v295_v9 = vlaneseq }
  0x4d   : > { %v388_v2 = vcombine.high %v225_v1, %v225_v1  ;;  %v387_v3 = vcombine.low %v225_v1, %v225_v1  ;;  %284 = vmatprep.mubr.bf16.mxu0 %v554_v5  ;;  %v454_v7 = vld [vmem:[%s190_s24] ss:$8 sps:$4 sm:$0xff]   ;;  %v222_v8 = vld [vmem:[#allocation4] sm:$0xf]  ;;  %vm312_vm3 = vcmask 7168  }
  0x4e   : > { %v296_v10 = vshrl.u32 %v295_v9, 7  ;;  %v293_v13 = vld [vmem:[%s737_s2] sm:$0x3] }
  0x4f   : > { %389 = vmatprep.subr.msk.bf16.mxu0 %vm245_vm1, %v388_v2  ;;  %v247_v6 = vsel %vm245_vm1, %v387_v3, 0 }
  0x50   : > { %265 = vmatpush1.bf16.msra.mxu0 %v247_v6  ;;  %v297_v11 = vsub.s32 0, %v296_v10  ;;  %v301_v12 = vsub.s32 1, %v296_v10 }
  0x51   : > { %266 = vmatprep.subr.bf16.mxu0 %v452_v4 }
  0x52   : > { %v298_v14 = vrot.slane %v293_v13, %v297_v11  ;;  %v302_v15 = vrot.slane %v293_v13, %v301_v12  ;;  %v307_v26 = vld [vmem:[%s738_s3] sm:$0xff] }
  0x53   : > { %v314_v29 = vld [vmem:[%s739_s4] sm:$0xff] }
  0x54   : > { %267 = vmatpush1.bf16.msra.mxu0 %v454_v7 }
  0x57   : > { %390 = vmatmul.mubr.msk.bf16.vlgmr.msra.gmra.mxu0 %vm241_vm2, %v222_v8 }
 0x117   : > { %v286_v16 = vpop.f32.mrf.mxu0 }
 0x118   : > { %v305_v18 = vmul.f32 %v298_v14, %v286_v16 }
 0x119   : > { %v288_v17 = vpop.f32.mrf.mxu0 }
 0x11a   : > { %v306_v19 = vmul.f32 %v302_v15, %v288_v17  ;;  %v315_v24 = vmul.f32 %v305_v18, %v305_v18 }
 0x11b   : > { %v290_v20 = vpop.f32.mrf.mxu0 }
 0x11c   : > { %v316_v21 = vmul.f32 %v306_v19, %v306_v19  ;;  %v308_v22 = vadd.f32 %v306_v19, %v305_v18 }
 0x11d   : > { %v291_v23 = vpop.f32.mrf.mxu0 }
 0x11e   : > { %309 = vadd.xlane.f32.xlu0 %v308_v22  ;;  %v317_v25 = vadd.f32 %v316_v21, %v315_v24 }
 0x122   : > { %318 = vadd.xlane.f32.xlu0 %v317_v25 }
 0x1a7   : > { %v310_v27 = vpop.xlane.xlu0 %309 }
 0x1a8   : > { %v311_v28 = vadd.f32 %v310_v27, %v307_v26 }
 0x1aa   : > { %313 = vst.msk [vmem:[%s738_s3] sm:$0xff] %vm312_vm3, %v311_v28 }
 0x1ab   : > { %v319_v30 = vpop.xlane.xlu0 %318 }
 0x1ac   : > { %v320_v31 = vadd.f32 %v319_v30, %v314_v29 }
 0x1ae   : > { %321 = vst.msk [vmem:[%s739_s4] sm:$0xff] %vm312_vm3, %v320_v31 }
 0x1af PF: > { %p16_p0 = scmp.ge.s32.totalorder %s600_s20, 4   ;;  %s755_s15 = smov %s539_s16 }
 0x1b0   : > { %s756_s16 = smov %s543_s17  ;;  %s757_s17 = smov %s610_s23 }
 0x1b1   : > { %s758_s18 = smov %s600_s20  ;;  %18 = sbr.rel (!%p16_p0) target bundleno = 4 (0x4), region = 84 }
 0x1b6   :  { %339 = vsyncpa [#allocation3], 1 }
 0x1b7   :  { %341 = vsyncpa [#allocation3 + $0x1], 1 }
 0x1b8   :  { %342 = vsyncpa [#allocation5], 1 }

</bundles_post_ra>
